<compile_context>
chip_gen: v6e
topology: v6e:2x2x1
jax: 0.10.0
libtpu: 0.0.40
codegen_flags: <defaults>
</compile_context>

<pallas_src>
import functools

import jax
import jax.numpy as jnp
from jax.experimental import pallas as pl
from jax.experimental.pallas import tpu as pltpu


def _round_up(x: int, m: int) -> int:
    return ((x + m - 1) // m) * m


def _cdiv(a: int, b: int) -> int:
    return (a + b - 1) // b


def _has_bf16_eup() -> bool:
    """True on chips with a bf16 EUP/VPU path (v6e / v7x); False otherwise (v5e)."""
    try:
        kind = jax.devices()[0].device_kind.lower()
    except Exception:
        return False
    return any(tag in kind for tag in ("v6", "v7", "7x"))


def _choose_batch_tiling(B: int, tb_max: int) -> tuple[int, int]:
    """Pick (tile_rows, padded_batch).

    * B <= 16: single 16-aligned tile.
    * otherwise: at least 2 tiles (v7x megacore sharding via "parallel"),
      16-aligned (bf16 sublane pack), dividing the padded batch tightly.
    """
    if B <= 16:
        tb = _round_up(max(B, 1), 16)
        return tb, tb
    n_tiles = max(2, _cdiv(B, tb_max))
    tb = min(tb_max, _round_up(_cdiv(B, n_tiles), 16))
    b_pad = _round_up(B, tb)
    return tb, b_pad


def _vmem_limit_bytes(tb, input_dim, inner_dim, nc_pad, x_bytes, out_bytes) -> int:
    # double-buffered x tile + single-buffered bf16 weights / f32 biases
    # + double-buffered output tile + f32/bf16 intermediates; 2x margin,
    # clamped to [32 MiB, 64 MiB] (safe on v5e/v6e/v7x).
    est = (2 * tb * input_dim * x_bytes
           + input_dim * inner_dim * 2 + inner_dim * 4
           + inner_dim * nc_pad * 2 + nc_pad * 4
           + 2 * tb * nc_pad * out_bytes
           + tb * inner_dim * (4 + 2) + tb * nc_pad * 4)
    return int(min(64 * 2**20, max(32 * 2**20, 2 * est)))


def _head_kernel(x_ref, w1_ref, b1_ref, w2_ref, b2_ref, o_ref, *, tanh_bf16):
    # Cast activations to bf16 in-kernel (VPU) -> bf16 MXU matmul, f32 accum.
    xb = x_ref[...].astype(jnp.bfloat16)
    h = jnp.dot(xb, w1_ref[...], preferred_element_type=jnp.float32)
    h = h + b1_ref[...]
    if tanh_bf16:
        a = jnp.tanh(h.astype(jnp.bfloat16))   # bf16 EUP path (v6e/v7x)
    else:
        a = jnp.tanh(h).astype(jnp.bfloat16)   # f32 EUP path (v5e)
    # TODO(synk): if the bundle dump shows the tanh/EUP phase serialized behind
    # the MXU, split the tile into 2-4 row sub-chunks (lax.fori_loop unroll=True
    # over pl.ds slices) so dot1 of chunk k+1 overlaps tanh/dot2 of chunk k.
    out = jnp.dot(a, w2_ref[...], preferred_element_type=jnp.float32)
    o_ref[...] = (out + b2_ref[...]).astype(o_ref.dtype)


def prepare_bart_head_params(w1, b1, w2, b2):
    """One-time (model-init) parameter prep: bf16 cast + lane padding.

    w1: [input_dim, inner_dim], b1: [inner_dim] or [1, inner_dim]
    w2: [inner_dim, num_classes], b2: [num_classes] or [1, num_classes]
    (weights stored transposed vs. PyTorch nn.Linear, i.e. [in, out]).
    """
    input_dim, inner_dim = w1.shape
    num_classes = w2.shape[1]
    nc_pad = _round_up(num_classes, 128)   # lane-dense output block

    w1_b = w1.astype(jnp.bfloat16)
    b1_f = jnp.reshape(b1, (1, inner_dim)).astype(jnp.float32)
    w2_p = jnp.zeros((inner_dim, nc_pad), jnp.bfloat16).at[:, :num_classes].set(
        w2.astype(jnp.bfloat16))
    b2_p = jnp.zeros((1, nc_pad), jnp.float32).at[:, :num_classes].set(
        jnp.reshape(b2, (1, num_classes)).astype(jnp.float32))
    return {"w1": w1_b, "b1": b1_f, "w2": w2_p, "b2": b2_p,
            "num_classes": num_classes}


def bart_classification_head(x, params, *, tb_max=512, out_dtype=None,
                             tanh_bf16=None):
    """x: [B, input_dim]; params from prepare_bart_head_params."""
    w1, b1, w2, b2 = params["w1"], params["b1"], params["w2"], params["b2"]
    num_classes = params["num_classes"]
    B, input_dim = x.shape
    inner_dim = w1.shape[1]
    nc_pad = w2.shape[1]
    out_dtype = x.dtype if out_dtype is None else out_dtype
    if tanh_bf16 is None:
        tanh_bf16 = _has_bf16_eup()

    tb, b_pad = _choose_batch_tiling(B, tb_max)
    # Row-pad only (no dtype cast in the wrapper; kernel casts to bf16 on VPU).
    # Note: padded rows produce tanh(b1) @ W2 + b2 garbage; they are sliced off
    # below and must not be reduced over by any fused consumer.
    if b_pad != B:
        x_p = jnp.zeros((b_pad, input_dim), x.dtype).at[:B].set(x)
    else:
        x_p = x

    vmem_limit = _vmem_limit_bytes(tb, input_dim, inner_dim, nc_pad,
                                   x.dtype.itemsize,
                                   jnp.dtype(out_dtype).itemsize)
    kernel = functools.partial(_head_kernel, tanh_bf16=tanh_bf16)

    def _run(single_buffer_weights: bool):
        resident = {}
        if single_buffer_weights:
            # Constant index_map + Buffered(1): weights stay VMEM-resident and
            # are not double-buffered (they are never refetched).
            resident["pipeline_mode"] = pl.Buffered(1)
        return pl.pallas_call(
            kernel,
            out_shape=jax.ShapeDtypeStruct((b_pad, nc_pad), out_dtype),
            grid_spec=pl.GridSpec(
                grid=(b_pad // tb,),
                in_specs=[
                    # x: tiled over batch, double-buffered/pipelined by Pallas.
                    pl.BlockSpec((tb, input_dim), lambda i: (i, 0)),
                    # weights / biases: VMEM-resident, single-buffered.
                    pl.BlockSpec((input_dim, inner_dim), lambda i: (0, 0), **resident),
                    pl.BlockSpec((1, inner_dim), lambda i: (0, 0), **resident),
                    pl.BlockSpec((inner_dim, nc_pad), lambda i: (0, 0), **resident),
                    pl.BlockSpec((1, nc_pad), lambda i: (0, 0), **resident),
                ],
                out_specs=pl.BlockSpec((tb, nc_pad), lambda i: (i, 0)),
            ),
            compiler_params=pltpu.CompilerParams(
                # batch tiles are independent -> shard across v7x's 2 TCs
                dimension_semantics=("parallel",),
                vmem_limit_bytes=vmem_limit),
        )(x_p, w1, b1, w2, b2)

    try:
        out_padded = _run(single_buffer_weights=True)
    except Exception:
        # Fallback for jax versions that reject pl.Buffered on a grid
        # pallas_call input: default double buffering is still correct, it
        # just uses 2x the resident weight VMEM.
        out_padded = _run(single_buffer_weights=False)

    return out_padded[:B, :num_classes]


def _init_linear(key, in_dim, out_dim, dtype=jnp.float32):
    """Deterministic init mimicking nn.Linear defaults (uniform +/- 1/sqrt(in))."""
    kw, kb = jax.random.split(key)
    bound = 1.0 / (in_dim ** 0.5)
    w = jax.random.uniform(kw, (in_dim, out_dim), dtype, -bound, bound)
    b = jax.random.uniform(kb, (1, out_dim), dtype, -bound, bound)
    return w, b


if __name__ == "__main__":
    # Small shapes consistent with the module's forward:
    # hidden_states [batch, input_dim], inner_dim, num_classes.
    batch, input_dim, inner_dim, num_classes = 8, 32, 32, 8

    key = jax.random.PRNGKey(0)
    kx, k1, k2 = jax.random.split(key, 3)

    x = jax.random.normal(kx, (batch, input_dim), jnp.float32)
    w1, b1 = _init_linear(k1, input_dim, inner_dim)
    w2, b2 = _init_linear(k2, inner_dim, num_classes)

    # One-time parameter prep (cast + pad) at "model init".
    params = prepare_bart_head_params(w1, b1, w2, b2)

    out = bart_classification_head(x, params)
    out = jax.block_until_ready(out)

    # Reference in plain JAX f32 (dropout is identity in eval mode). Kernel
    # uses bf16 matmul operands with f32 accumulation (logits differ at ~1e-2),
    # so tolerance is loosened accordingly.
    ref = jnp.tanh(x @ w1 + b1) @ w2 + b2
    assert out.shape == (batch, num_classes)
    assert jnp.allclose(out, ref, atol=5e-2, rtol=5e-2)

    print("KERNEL_OK")
</pallas_src>

<mosaic_0001>
module attributes {stable_mosaic.version = 11 : i64} {
  func.func @_head_kernel(%arg0: i32, %arg1: memref<16x32xf32, #tpu.memory_space<vmem>>, %arg2: memref<32x32xbf16, #tpu.memory_space<vmem>>, %arg3: memref<1x32xf32, #tpu.memory_space<vmem>>, %arg4: memref<32x128xbf16, #tpu.memory_space<vmem>>, %arg5: memref<1x128xf32, #tpu.memory_space<vmem>>, %arg6: memref<16x128xf32, #tpu.memory_space<vmem>>) attributes {dimension_semantics = [#tpu.dimension_semantics<parallel>], iteration_bounds = array<i64: 1>, scalar_prefetch = 0 : i64, scratch_operands = 0 : i64, tpu.core_type = #tpu.core_type<tc>, window_params = [{transform_indices = @transform_0, window_bounds = array<i64: 16, 32>}, {pipeline_mode = #tpu.pipeline_mode<synchronous>, transform_indices = @transform_1, window_bounds = array<i64: 32, 32>}, {pipeline_mode = #tpu.pipeline_mode<synchronous>, transform_indices = @transform_2, window_bounds = array<i64: 1, 32>}, {pipeline_mode = #tpu.pipeline_mode<synchronous>, transform_indices = @transform_3, window_bounds = array<i64: 32, 128>}, {pipeline_mode = #tpu.pipeline_mode<synchronous>, transform_indices = @transform_4, window_bounds = array<i64: 1, 128>}, {transform_indices = @transform_5, window_bounds = array<i64: 16, 128>}]} {
    %c0 = arith.constant 0 : index
    %c0_0 = arith.constant 0 : index
    %0 = vector.load %arg1[%c0, %c0_0] : memref<16x32xf32, #tpu.memory_space<vmem>>, vector<16x32xf32>
    %1 = arith.truncf %0 : vector<16x32xf32> to vector<16x32xbf16>
    %c0_1 = arith.constant 0 : index
    %c0_2 = arith.constant 0 : index
    %2 = vector.load %arg2[%c0_1, %c0_2] : memref<32x32xbf16, #tpu.memory_space<vmem>>, vector<32x32xbf16>
    %cst = arith.constant dense<0.000000e+00> : vector<16x32xf32>
    %3 = tpu.matmul %1, %2, %cst {dimension_numbers = #tpu.dot_dimension_numbers<[1], [0], [0], [1], [0, 0, 1, 1], [], []>} : vector<16x32xbf16>, vector<32x32xbf16>, vector<16x32xf32> -> vector<16x32xf32>
    %c0_3 = arith.constant 0 : index
    %c0_4 = arith.constant 0 : index
    %4 = vector.load %arg3[%c0_3, %c0_4] : memref<1x32xf32, #tpu.memory_space<vmem>>, vector<1x32xf32>
    %5 = vector.broadcast %4 : vector<1x32xf32> to vector<16x32xf32>
    %6 = arith.addf %3, %5 : vector<16x32xf32>
    %7 = math.tanh %6 : vector<16x32xf32>
    %8 = arith.truncf %7 : vector<16x32xf32> to vector<16x32xbf16>
    %c0_5 = arith.constant 0 : index
    %c0_6 = arith.constant 0 : index
    %9 = vector.load %arg4[%c0_5, %c0_6] : memref<32x128xbf16, #tpu.memory_space<vmem>>, vector<32x128xbf16>
    %cst_7 = arith.constant dense<0.000000e+00> : vector<16x128xf32>
    %10 = tpu.matmul %8, %9, %cst_7 {dimension_numbers = #tpu.dot_dimension_numbers<[1], [0], [0], [1], [0, 0, 1, 1], [], []>} : vector<16x32xbf16>, vector<32x128xbf16>, vector<16x128xf32> -> vector<16x128xf32>
    %c0_8 = arith.constant 0 : index
    %c0_9 = arith.constant 0 : index
    %11 = vector.load %arg5[%c0_8, %c0_9] : memref<1x128xf32, #tpu.memory_space<vmem>>, vector<1x128xf32>
    %12 = vector.broadcast %11 : vector<1x128xf32> to vector<16x128xf32>
    %13 = arith.addf %10, %12 : vector<16x128xf32>
    %c0_10 = arith.constant 0 : index
    %c0_11 = arith.constant 0 : index
    %14 = vector.load %arg6[%c0_10, %c0_11] : memref<16x128xf32, #tpu.memory_space<vmem>>, vector<16x128xf32>
    tpu.vector_store %arg6[%c0_10, %c0_11], %13 {strides = array<i32>} : memref<16x128xf32, #tpu.memory_space<vmem>>, vector<16x128xf32>,
    return
  }
  func.func @transform_0(%arg0: i32) -> (i32, i32) {
    %c0_i32 = arith.constant 0 : i32
    %c0_i32_0 = arith.constant 0 : i32
    return %arg0, %c0_i32 : i32, i32
  }
  func.func @transform_1(%arg0: i32) -> (i32, i32) {
    %c0_i32 = arith.constant 0 : i32
    %c0_i32_0 = arith.constant 0 : i32
    %c0_i32_1 = arith.constant 0 : i32
    return %c0_i32, %c0_i32_0 : i32, i32
  }
  func.func @transform_2(%arg0: i32) -> (i32, i32) {
    %c0_i32 = arith.constant 0 : i32
    %c0_i32_0 = arith.constant 0 : i32
    %c0_i32_1 = arith.constant 0 : i32
    return %c0_i32, %c0_i32_0 : i32, i32
  }
  func.func @transform_3(%arg0: i32) -> (i32, i32) {
    %c0_i32 = arith.constant 0 : i32
    %c0_i32_0 = arith.constant 0 : i32
    %c0_i32_1 = arith.constant 0 : i32
    return %c0_i32, %c0_i32_0 : i32, i32
  }
  func.func @transform_4(%arg0: i32) -> (i32, i32) {
    %c0_i32 = arith.constant 0 : i32
    %c0_i32_0 = arith.constant 0 : i32
    %c0_i32_1 = arith.constant 0 : i32
    return %c0_i32, %c0_i32_0 : i32, i32
  }
  func.func @transform_5(%arg0: i32) -> (i32, i32) {
    %c0_i32 = arith.constant 0 : i32
    %c0_i32_0 = arith.constant 0 : i32
    return %arg0, %c0_i32 : i32, i32
  }
}

module attributes {stable_mosaic.version = 11 : i64} {
  func.func @_head_kernel(%arg0: i32, %arg1: memref<16x32xf32, #tpu.memory_space<vmem>>, %arg2: memref<32x32xbf16, #tpu.memory_space<vmem>>, %arg3: memref<1x32xf32, #tpu.memory_space<vmem>>, %arg4: memref<32x128xbf16, #tpu.memory_space<vmem>>, %arg5: memref<1x128xf32, #tpu.memory_space<vmem>>, %arg6: memref<16x128xf32, #tpu.memory_space<vmem>>) attributes {dimension_semantics = [#tpu.dimension_semantics<parallel>], iteration_bounds = array<i64: 1>, scalar_prefetch = 0 : i64, scratch_operands = 0 : i64, tpu.core_type = #tpu.core_type<tc>, window_params = [{transform_indices = @transform_0, window_bounds = array<i64: 16, 32>}, {pipeline_mode = #tpu.pipeline_mode<synchronous>, transform_indices = @transform_1, window_bounds = array<i64: 32, 32>}, {pipeline_mode = #tpu.pipeline_mode<synchronous>, transform_indices = @transform_2, window_bounds = array<i64: 1, 32>}, {pipeline_mode = #tpu.pipeline_mode<synchronous>, transform_indices = @transform_3, window_bounds = array<i64: 32, 128>}, {pipeline_mode = #tpu.pipeline_mode<synchronous>, transform_indices = @transform_4, window_bounds = array<i64: 1, 128>}, {transform_indices = @transform_5, window_bounds = array<i64: 16, 128>}]} {
    %c0 = arith.constant 0 : index
    %c0_0 = arith.constant 0 : index
    %0 = vector.load %arg1[%c0, %c0_0] : memref<16x32xf32, #tpu.memory_space<vmem>>, vector<16x32xf32>
    %1 = arith.truncf %0 : vector<16x32xf32> to vector<16x32xbf16>
    %c0_1 = arith.constant 0 : index
    %c0_2 = arith.constant 0 : index
    %2 = vector.load %arg2[%c0_1, %c0_2] : memref<32x32xbf16, #tpu.memory_space<vmem>>, vector<32x32xbf16>
    %cst = arith.constant dense<0.000000e+00> : vector<16x32xf32>
    %3 = tpu.matmul %1, %2, %cst {dimension_numbers = #tpu.dot_dimension_numbers<[1], [0], [0], [1], [0, 0, 1, 1], [], []>} : vector<16x32xbf16>, vector<32x32xbf16>, vector<16x32xf32> -> vector<16x32xf32>
    %c0_3 = arith.constant 0 : index
    %c0_4 = arith.constant 0 : index
    %4 = vector.load %arg3[%c0_3, %c0_4] : memref<1x32xf32, #tpu.memory_space<vmem>>, vector<1x32xf32>
    %5 = vector.broadcast %4 : vector<1x32xf32> to vector<16x32xf32>
    %6 = arith.addf %3, %5 : vector<16x32xf32>
    %7 = math.tanh %6 : vector<16x32xf32>
    %8 = arith.truncf %7 : vector<16x32xf32> to vector<16x32xbf16>
    %c0_5 = arith.constant 0 : index
    %c0_6 = arith.constant 0 : index
    %9 = vector.load %arg4[%c0_5, %c0_6] : memref<32x128xbf16, #tpu.memory_space<vmem>>, vector<32x128xbf16>
    %cst_7 = arith.constant dense<0.000000e+00> : vector<16x128xf32>
    %10 = tpu.matmul %8, %9, %cst_7 {dimension_numbers = #tpu.dot_dimension_numbers<[1], [0], [0], [1], [0, 0, 1, 1], [], []>} : vector<16x32xbf16>, vector<32x128xbf16>, vector<16x128xf32> -> vector<16x128xf32>
    %c0_8 = arith.constant 0 : index
    %c0_9 = arith.constant 0 : index
    %11 = vector.load %arg5[%c0_8, %c0_9] : memref<1x128xf32, #tpu.memory_space<vmem>>, vector<1x128xf32>
    %12 = vector.broadcast %11 : vector<1x128xf32> to vector<16x128xf32>
    %13 = arith.addf %10, %12 : vector<16x128xf32>
    %c0_10 = arith.constant 0 : index
    %c0_11 = arith.constant 0 : index
    %14 = vector.load %arg6[%c0_10, %c0_11] : memref<16x128xf32, #tpu.memory_space<vmem>>, vector<16x128xf32>
    tpu.vector_store %arg6[%c0_10, %c0_11], %13 {strides = array<i32>} : memref<16x128xf32, #tpu.memory_space<vmem>>, vector<16x128xf32>,
    return
  }
  func.func @transform_0(%arg0: i32) -> (i32, i32) {
    %c0_i32 = arith.constant 0 : i32
    %c0_i32_0 = arith.constant 0 : i32
    return %arg0, %c0_i32 : i32, i32
  }
  func.func @transform_1(%arg0: i32) -> (i32, i32) {
    %c0_i32 = arith.constant 0 : i32
    %c0_i32_0 = arith.constant 0 : i32
    %c0_i32_1 = arith.constant 0 : i32
    return %c0_i32, %c0_i32_0 : i32, i32
  }
  func.func @transform_2(%arg0: i32) -> (i32, i32) {
    %c0_i32 = arith.constant 0 : i32
    %c0_i32_0 = arith.constant 0 : i32
    %c0_i32_1 = arith.constant 0 : i32
    return %c0_i32, %c0_i32_0 : i32, i32
  }
  func.func @transform_3(%arg0: i32) -> (i32, i32) {
    %c0_i32 = arith.constant 0 : i32
    %c0_i32_0 = arith.constant 0 : i32
    %c0_i32_1 = arith.constant 0 : i32
    return %c0_i32, %c0_i32_0 : i32, i32
  }
  func.func @transform_4(%arg0: i32) -> (i32, i32) {
    %c0_i32 = arith.constant 0 : i32
    %c0_i32_0 = arith.constant 0 : i32
    %c0_i32_1 = arith.constant 0 : i32
    return %c0_i32, %c0_i32_0 : i32, i32
  }
  func.func @transform_5(%arg0: i32) -> (i32, i32) {
    %c0_i32 = arith.constant 0 : i32
    %c0_i32_0 = arith.constant 0 : i32
    return %arg0, %c0_i32 : i32, i32
  }
}

</mosaic_0001>

<bundles_post_ra>
// kernel: tpu_custom_call.1
= control target key start
LH: loop header
LB: loop body
LE: loop exit
PB: predicated region body
PF: predicated region fallthrough
CT: control target
= control target key end

     0   :  { %10 = vsyncpa [#allocation3], 0  ;;  %s424_s0 = inlined_call_operand.hbm [shape: f32[16,32], index: 0, kind: input, shape index: {}]   ;;  %s425_s1 = inlined_call_operand.hbm [shape: bf16[32,32], index: 1, kind: input, shape index: {}]   ;;  %s426_s2 = inlined_call_operand.vmem [shape: f32[1,32], index: 2, kind: input, shape index: {}]   ;;  %s427_s3 = inlined_call_operand.hbm [shape: bf16[32,128], index: 3, kind: input, shape index: {}]   ;;  %s428_s4 = inlined_call_operand.vmem [shape: f32[1,128], index: 4, kind: input, shape index: {}]   ;;  %s429_s5 = inlined_call_operand.hbm [shape: f32[16,128], index: 5, kind: output, shape index: {}]  }
   0x1   :  { %11 = vsyncpa [#allocation6], 0 }
   0x2   :  { %12 = vsyncpa [#allocation4], 0  ;;  %s358_s18 = smov [#allocation5]  }
   0x3   :  { %s30_s19 = sshll.u32 %s358_s18, 4  ;;  %s31_s19 = int_to_ptr.vmem [resolvable:$true] %s30_s19 }
   0x4   :  { %s280_s20 = scalar_lea.vmem %s31_s19, 256  ;;  %p285_p1 = scmp.lt.s32.totalorder %s31_s19, %s31_s19 }
   0x5   :  { %p281_p0 = scmp.ne.s32.totalorder %s31_s19, %s280_s20  ;;  %p286_p2 = scmp.lt.s32.totalorder %s280_s20, %s280_s20 }
   0x7   :  { %p287_p3 = por %p286_p2, %p285_p1 }
   0x9   :  { %p288_p4 = pnand %p287_p3, %p281_p0 }
   0xb   :  { %291 = shalt.err (!%p288_p4)
}
   0xc   :  { %s359_s21 = smov 64   ;;  %s360_s22 = smov 4  }
   0xd   :  { %36 = dma.hbm_to_vmem [thread:$0]  %s425_s1, 256, %s31_s19, [#allocation6], %s359_s21, %s359_s21, %s360_s22  }
   0xe   :  { %s361_s25 = smov [#allocation2]  }
   0xf   :  { %s18_s26 = sshll.u32 %s361_s25, 4  ;;  %s19_s26 = int_to_ptr.vmem [resolvable:$true] %s18_s26 }
  0x10   :  { %s300_s27 = scalar_lea.vmem %s19_s26, 256  ;;  %p305_p6 = scmp.lt.s32.totalorder %s19_s26, %s19_s26 }
  0x11   :  { %p301_p5 = scmp.ne.s32.totalorder %s19_s26, %s300_s27  ;;  %p306_p7 = scmp.lt.s32.totalorder %s300_s27, %s300_s27 }
  0x13   :  { %p307_p8 = por %p306_p7, %p305_p6 }
  0x15   :  { %p308_p9 = pnand %p307_p8, %p301_p5 }
  0x17   :  { %311 = shalt.err (!%p308_p9)
}
  0x18   :  { %s362_s28 = smov 128   ;;  %s363_s29 = smov 8  }
  0x19   :  { %24 = dma.hbm_to_vmem [thread:$0]  %s424_s0, 256, %s19_s26, [#allocation3], %s362_s28, %s362_s28, %s363_s29  }
  0x1a   :  { %s364_s1 = smov [#allocation7]  }
  0x1b   :  { %s44_s7 = sshll.u32 %s364_s1, 4  ;;  %s45_s7 = int_to_ptr.vmem [resolvable:$true] %s44_s7 }
  0x1c   :  { %s320_s8 = scalar_lea.vmem %s45_s7, 256  ;;  %p325_p11 = scmp.lt.s32.totalorder %s45_s7, %s45_s7 }
  0x1d   :  { %p321_p10 = scmp.ne.s32.totalorder %s45_s7, %s320_s8  ;;  %p326_p12 = scmp.lt.s32.totalorder %s320_s8, %s320_s8 }
  0x1f   :  { %p327_p13 = por %p326_p12, %p325_p11 }
  0x21   :  { %p328_p0 = pnand %p327_p13, %p321_p10 }
  0x23   :  { %331 = shalt.err (!%p328_p0)
}
  0x24   :  { %50 = dma.hbm_to_vmem [thread:$0]  %s427_s3, 256, %s45_s7, [#allocation6], %s359_s21, %s359_s21, %s360_s22  }
  0x25   :  { %352 = dma.done.wait [#allocation3], 256  }
  0x26   :  { %353 = vsyncadd [#allocation3], 4294967040 }
  0x27   :  { %354 = dma.done.wait [#allocation6], 512  }
  0x28   :  { %355 = vsyncadd [#allocation6], 4294966784  ;;  %v365_v0 = vmov 0.0   ;;  %vm366_vm0 = vmmov 0   ;;  %v264_v1 = vld [vmem:[#allocation5 + $0x8] sm:$0xff]   ;;  %v265_v2 = vld [vmem:[#allocation5] sm:$0xff]  }
  0x29   :  { %238 = vmatprep.subr.bf16.mxu0 %v365_v0  ;;  %242 = vmatprep.mubr.msk.bf16.mxu0 %vm366_vm0, %v365_v0  ;;  %v63_v3 = vld [vmem:[#allocation2] sm:$0xff]  ;;  %v64_v4 = vld [vmem:[#allocation2 + $0x8] sm:$0xff]  ;;  %vm89_vm1 = vcmask 261120  }
  0x2a   :  { %246 = vmatprep.subr.bf16.mxu1 %v365_v0  ;;  %250 = vmatprep.mubr.msk.bf16.mxu1 %vm366_vm0, %v365_v0  ;;  %v65_v5 = vpack.c.bf16 %v64_v4, %v63_v3  ;;  %v266_v6 = vld [vmem:[#allocation7 + $0x8] sm:$0xff]   ;;  %v267_v7 = vld [vmem:[#allocation7] sm:$0xff]  }
  0x2b   :  { %239 = vmatpush3.bf16.msra.mxu0 %v264_v1  ;;  %247 = vmatpush3.bf16.msra.mxu1 %v266_v6  ;;  %v224_v8 = vld [vmem:[%s426_s2] ss:$0 sm:$0xff]  ;;  %s367_s2 = smov [#allocation8]  }
  0x2c   :  { %240 = vmatprep.subr.bf16.mxu0 %v365_v0  ;;  %248 = vmatprep.subr.bf16.mxu1 %v365_v0  ;;  %v228_v18 = vld [vmem:[%s428_s4] ss:$0 sm:$0xff]  ;;  %s211_s13 = sshll.u32 %s367_s2, 4  ;;  %s212_s13 = int_to_ptr.vmem [resolvable:$true] %s211_s13 }
  0x2d   :  { %s332_s14 = scalar_lea.vmem %s212_s13, 256  ;;  %p337_p2 = scmp.lt.s32.totalorder %s212_s13, %s212_s13 }
  0x2e   :  { %p333_p1 = scmp.ne.s32.totalorder %s212_s13, %s332_s14  ;;  %p338_p3 = scmp.lt.s32.totalorder %s332_s14, %s332_s14 }
  0x2f   :  { %241 = vmatpush3.bf16.msra.mxu0 %v265_v2  ;;  %249 = vmatpush3.bf16.msra.mxu1 %v267_v7 }
  0x30   :  { %p339_p4 = por %p338_p3, %p337_p2 }
  0x32   :  { %243 = vmatmul.mubr.msk.bf16.vlgmr.msra.gmra.mxu0 %vm89_vm1, %v65_v5  ;;  %p340_p5 = pnand %p339_p4, %p333_p1 }
  0xf2   :  { %v127_v9 = vpop.f32.mrf.mxu0 }
  0xf3   :  { %v128_v10 = vadd.f32 %v224_v8, %v127_v9 }
  0xf4   :  { %v244_v11 = vpop.f32.mrf.mxu0 }
  0xf5   :  { %268 = vtanh.f32 %v128_v10 }
  0xf6   :  { %v130_v12 = vpop.f32.mrf.mxu0 }
  0xf7   :  { %v131_v13 = vadd.f32 %v224_v8, %v130_v12 }
  0xf8   :  { %v245_v14 = vpop.f32.mrf.mxu0 }
  0xf9   :  { %270 = vtanh.f32 %v131_v13 }
 0x102   :  { %v269_v15 = vpop.eup %268 }
 0x106   :  { %v271_v16 = vpop.eup %270 }
 0x107   :  { %v136_v17 = vpack.c.bf16 %v271_v16, %v269_v15 }
 0x109   :  { %251 = vmatmul.mubr.msk.bf16.vlgmr.msra.gmra.mxu1 %vm89_vm1, %v136_v17 }
 0x1c9   :  { %v197_v19 = vpop.f32.mrf.mxu1 }
 0x1ca   :  { %v198_v20 = vadd.f32 %v228_v18, %v197_v19 }
 0x1cb   :  { %v252_v21 = vpop.f32.mrf.mxu1 }
 0x1cc   :  { %204 = vst [vmem:[#allocation8] sm:$0xff] %v198_v20 }
 0x1cd   :  { %v200_v22 = vpop.f32.mrf.mxu1 }
 0x1ce   :  { %v201_v23 = vadd.f32 %v228_v18, %v200_v22 }
 0x1cf   :  { %v253_v24 = vpop.f32.mrf.mxu1 }
 0x1d0   :  { %205 = vst [vmem:[#allocation8 + $0x8] sm:$0xff] %v201_v23 }
 0x1d1   :  { %343 = shalt.err (!%p340_p5)
}
 0x1d2   :  { %217 = dma.vmem_to_hbm [thread:$0]  %s212_s13, 256, %s429_s5, [#allocation4], %s362_s28, %s362_s28, %s363_s29  }
 0x1d3   :  { %356 = dma.done.wait [#allocation4], 256  }
 0x1d4   :  { %357 = vsyncadd [#allocation4], 4294967040 }
 0x1d5   :  { %221 = vsyncpa [#allocation3], 1 }
 0x1d6   :  { %222 = vsyncpa [#allocation6], 1 }
 0x1d7   :  { %223 = vsyncpa [#allocation4], 1 }

// kernel: tpu_custom_call.1
= control target key start
LH: loop header
LB: loop body
LE: loop exit
PB: predicated region body
PF: predicated region fallthrough
CT: control target
= control target key end

     0   :  { %10 = vsyncpa [#allocation3], 0  ;;  %s424_s0 = inlined_call_operand.hbm [shape: f32[16,32], index: 0, kind: input, shape index: {}]   ;;  %s425_s1 = inlined_call_operand.hbm [shape: bf16[32,32], index: 1, kind: input, shape index: {}]   ;;  %s426_s2 = inlined_call_operand.vmem [shape: f32[1,32], index: 2, kind: input, shape index: {}]   ;;  %s427_s3 = inlined_call_operand.hbm [shape: bf16[32,128], index: 3, kind: input, shape index: {}]   ;;  %s428_s4 = inlined_call_operand.vmem [shape: f32[1,128], index: 4, kind: input, shape index: {}]   ;;  %s429_s5 = inlined_call_operand.hbm [shape: f32[16,128], index: 5, kind: output, shape index: {}]  }
   0x1   :  { %11 = vsyncpa [#allocation6], 0 }
   0x2   :  { %12 = vsyncpa [#allocation4], 0  ;;  %s358_s18 = smov [#allocation5]  }
   0x3   :  { %s30_s19 = sshll.u32 %s358_s18, 4  ;;  %s31_s19 = int_to_ptr.vmem [resolvable:$true] %s30_s19 }
   0x4   :  { %s280_s20 = scalar_lea.vmem %s31_s19, 256  ;;  %p285_p1 = scmp.lt.s32.totalorder %s31_s19, %s31_s19 }
   0x5   :  { %p281_p0 = scmp.ne.s32.totalorder %s31_s19, %s280_s20  ;;  %p286_p2 = scmp.lt.s32.totalorder %s280_s20, %s280_s20 }
   0x7   :  { %p287_p3 = por %p286_p2, %p285_p1 }
   0x9   :  { %p288_p4 = pnand %p287_p3, %p281_p0 }
   0xb   :  { %291 = shalt.err (!%p288_p4)
}
   0xc   :  { %s359_s21 = smov 64   ;;  %s360_s22 = smov 4  }
   0xd   :  { %36 = dma.hbm_to_vmem [thread:$0]  %s425_s1, 256, %s31_s19, [#allocation6], %s359_s21, %s359_s21, %s360_s22  }
   0xe   :  { %s361_s25 = smov [#allocation2]  }
   0xf   :  { %s18_s26 = sshll.u32 %s361_s25, 4  ;;  %s19_s26 = int_to_ptr.vmem [resolvable:$true] %s18_s26 }
  0x10   :  { %s300_s27 = scalar_lea.vmem %s19_s26, 256  ;;  %p305_p6 = scmp.lt.s32.totalorder %s19_s26, %s19_s26 }
  0x11   :  { %p301_p5 = scmp.ne.s32.totalorder %s19_s26, %s300_s27  ;;  %p306_p7 = scmp.lt.s32.totalorder %s300_s27, %s300_s27 }
  0x13   :  { %p307_p8 = por %p306_p7, %p305_p6 }
  0x15   :  { %p308_p9 = pnand %p307_p8, %p301_p5 }
  0x17   :  { %311 = shalt.err (!%p308_p9)
}
  0x18   :  { %s362_s28 = smov 128   ;;  %s363_s29 = smov 8  }
  0x19   :  { %24 = dma.hbm_to_vmem [thread:$0]  %s424_s0, 256, %s19_s26, [#allocation3], %s362_s28, %s362_s28, %s363_s29  }
  0x1a   :  { %s364_s1 = smov [#allocation7]  }
  0x1b   :  { %s44_s7 = sshll.u32 %s364_s1, 4  ;;  %s45_s7 = int_to_ptr.vmem [resolvable:$true] %s44_s7 }
  0x1c   :  { %s320_s8 = scalar_lea.vmem %s45_s7, 256  ;;  %p325_p11 = scmp.lt.s32.totalorder %s45_s7, %s45_s7 }
  0x1d   :  { %p321_p10 = scmp.ne.s32.totalorder %s45_s7, %s320_s8  ;;  %p326_p12 = scmp.lt.s32.totalorder %s320_s8, %s320_s8 }
  0x1f   :  { %p327_p13 = por %p326_p12, %p325_p11 }
  0x21   :  { %p328_p0 = pnand %p327_p13, %p321_p10 }
  0x23   :  { %331 = shalt.err (!%p328_p0)
}
  0x24   :  { %50 = dma.hbm_to_vmem [thread:$0]  %s427_s3, 256, %s45_s7, [#allocation6], %s359_s21, %s359_s21, %s360_s22  }
  0x25   :  { %352 = dma.done.wait [#allocation3], 256  }
  0x26   :  { %353 = vsyncadd [#allocation3], 4294967040 }
  0x27   :  { %354 = dma.done.wait [#allocation6], 512  }
  0x28   :  { %355 = vsyncadd [#allocation6], 4294966784  ;;  %v365_v0 = vmov 0.0   ;;  %vm366_vm0 = vmmov 0   ;;  %v264_v1 = vld [vmem:[#allocation5 + $0x8] sm:$0xff]   ;;  %v265_v2 = vld [vmem:[#allocation5] sm:$0xff]  }
  0x29   :  { %238 = vmatprep.subr.bf16.mxu0 %v365_v0  ;;  %242 = vmatprep.mubr.msk.bf16.mxu0 %vm366_vm0, %v365_v0  ;;  %v63_v3 = vld [vmem:[#allocation2] sm:$0xff]  ;;  %v64_v4 = vld [vmem:[#allocation2 + $0x8] sm:$0xff]  ;;  %vm89_vm1 = vcmask 261120  }
  0x2a   :  { %246 = vmatprep.subr.bf16.mxu1 %v365_v0  ;;  %250 = vmatprep.mubr.msk.bf16.mxu1 %vm366_vm0, %v365_v0  ;;  %v65_v5 = vpack.c.bf16 %v64_v4, %v63_v3  ;;  %v266_v6 = vld [vmem:[#allocation7 + $0x8] sm:$0xff]   ;;  %v267_v7 = vld [vmem:[#allocation7] sm:$0xff]  }
  0x2b   :  { %239 = vmatpush3.bf16.msra.mxu0 %v264_v1  ;;  %247 = vmatpush3.bf16.msra.mxu1 %v266_v6  ;;  %v224_v8 = vld [vmem:[%s426_s2] ss:$0 sm:$0xff]  ;;  %s367_s2 = smov [#allocation8]  }
  0x2c   :  { %240 = vmatprep.subr.bf16.mxu0 %v365_v0  ;;  %248 = vmatprep.subr.bf16.mxu1 %v365_v0  ;;  %v228_v18 = vld [vmem:[%s428_s4] ss:$0 sm:$0xff]  ;;  %s211_s13 = sshll.u32 %s367_s2, 4  ;;  %s212_s13 = int_to_ptr.vmem [resolvable:$true] %s211_s13 }
  0x2d   :  { %s332_s14 = scalar_lea.vmem %s212_s13, 256  ;;  %p337_p2 = scmp.lt.s32.totalorder %s212_s13, %s212_s13 }
  0x2e   :  { %p333_p1 = scmp.ne.s32.totalorder %s212_s13, %s332_s14  ;;  %p338_p3 = scmp.lt.s32.totalorder %s332_s14, %s332_s14 }
  0x2f   :  { %241 = vmatpush3.bf16.msra.mxu0 %v265_v2  ;;  %249 = vmatpush3.bf16.msra.mxu1 %v267_v7 }
  0x30   :  { %p339_p4 = por %p338_p3, %p337_p2 }
  0x32   :  { %243 = vmatmul.mubr.msk.bf16.vlgmr.msra.gmra.mxu0 %vm89_vm1, %v65_v5  ;;  %p340_p5 = pnand %p339_p4, %p333_p1 }
  0xf2   :  { %v127_v9 = vpop.f32.mrf.mxu0 }
  0xf3   :  { %v128_v10 = vadd.f32 %v224_v8, %v127_v9 }
  0xf4   :  { %v244_v11 = vpop.f32.mrf.mxu0 }
  0xf5   :  { %268 = vtanh.f32 %v128_v10 }
  0xf6   :  { %v130_v12 = vpop.f32.mrf.mxu0 }
  0xf7   :  { %v131_v13 = vadd.f32 %v224_v8, %v130_v12 }
  0xf8   :  { %v245_v14 = vpop.f32.mrf.mxu0 }
  0xf9   :  { %270 = vtanh.f32 %v131_v13 }
 0x102   :  { %v269_v15 = vpop.eup %268 }
 0x106   :  { %v271_v16 = vpop.eup %270 }
 0x107   :  { %v136_v17 = vpack.c.bf16 %v271_v16, %v269_v15 }
 0x109   :  { %251 = vmatmul.mubr.msk.bf16.vlgmr.msra.gmra.mxu1 %vm89_vm1, %v136_v17 }
 0x1c9   :  { %v197_v19 = vpop.f32.mrf.mxu1 }
 0x1ca   :  { %v198_v20 = vadd.f32 %v228_v18, %v197_v19 }
 0x1cb   :  { %v252_v21 = vpop.f32.mrf.mxu1 }
 0x1cc   :  { %204 = vst [vmem:[#allocation8] sm:$0xff] %v198_v20 }
 0x1cd   :  { %v200_v22 = vpop.f32.mrf.mxu1 }
 0x1ce   :  { %v201_v23 = vadd.f32 %v228_v18, %v200_v22 }
 0x1cf   :  { %v253_v24 = vpop.f32.mrf.mxu1 }
 0x1d0   :  { %205 = vst [vmem:[#allocation8 + $0x8] sm:$0xff] %v201_v23 }
 0x1d1   :  { %343 = shalt.err (!%p340_p5)
}
 0x1d2   :  { %217 = dma.vmem_to_hbm [thread:$0]  %s212_s13, 256, %s429_s5, [#allocation4], %s362_s28, %s362_s28, %s363_s29  }
 0x1d3   :  { %356 = dma.done.wait [#allocation4], 256  }
 0x1d4   :  { %357 = vsyncadd [#allocation4], 4294967040 }
 0x1d5   :  { %221 = vsyncpa [#allocation3], 1 }
 0x1d6   :  { %222 = vsyncpa [#allocation6], 1 }
 0x1d7   :  { %223 = vsyncpa [#allocation4], 1 }

</bundles_post_ra>
